<compile_context>
chip_gen: v6e
topology: v6e:2x2x1
jax: 0.10.0
libtpu: 0.0.40
codegen_flags: <defaults>
</compile_context>

<pallas_src>
import functools
import math

import jax
import jax.numpy as jnp
from jax import lax
from jax.experimental import pallas as pl
from jax.experimental.pallas import tpu as pltpu


def _qkv_proj_kernel(x_ref, wqkv_ref, bqkv_ref, qkv_ref):
    # x_ref: (1, Tq, H)   wqkv_ref: (H, 3H)   bqkv_ref: (1, 3H)   qkv_ref: (1, Tq, 3H)
    x = x_ref[0]                                   # (Tq, H), native dtype
    w = wqkv_ref[...]                              # (H, 3H), native dtype
    b = bqkv_ref[...].astype(jnp.float32)          # (1, 3H)
    y = jnp.dot(x, w, preferred_element_type=jnp.float32) + b   # f32 accumulate
    qkv_ref[0] = y.astype(qkv_ref.dtype)           # lane-dense store, native dtype


def _flash_attn_kernel(qkv_q_ref, qkv_kv_ref, o_ref, m_ref, l_ref, acc_ref, *,
                       num_heads, head_dim, hidden):
    # qkv_q_ref : (1, Tq, 3H)  rows of the current query tile
    # qkv_kv_ref: (1, Tk, 3H)  rows of the current key/value tile
    # o_ref     : (1, Tq, H)   head-packed output tile
    # scratch   : m (nh, Tq, 1), l (nh, Tq, 1), acc (Tq, H)  -- all f32
    ki = pl.program_id(2)

    @pl.when(ki == 0)
    def _init():
        m_ref[...] = jnp.full_like(m_ref, -jnp.inf)
        l_ref[...] = jnp.zeros_like(l_ref)
        acc_ref[...] = jnp.zeros_like(acc_ref)

    H, Dh = hidden, head_dim

    # TODO(synk): for large num_heads move heads onto a grid axis (or use a
    # head-major qkv layout + lax.fori_loop) to bound live ranges; the static
    # unroll is fine for small head counts.
    for h in range(num_heads):
        # Slice the refs (not a loaded (Tq,3H) value) so only (T, Dh) slabs are
        # live per head.  q was pre-scaled by 1/sqrt(Dh) via the fused weights.
        q = qkv_q_ref[0, :, h * Dh:(h + 1) * Dh]                     # (Tq, Dh)
        k = qkv_kv_ref[0, :, H + h * Dh:H + (h + 1) * Dh]            # (Tk, Dh)
        v = qkv_kv_ref[0, :, 2 * H + h * Dh:2 * H + (h + 1) * Dh]    # (Tk, Dh)

        # scores tile = q @ k^T without materializing a transpose of k.
        s = lax.dot_general(q, k, (((1,), (1,)), ((), ())),
                            preferred_element_type=jnp.float32)      # (Tq, Tk)

        # Online (flash) softmax statistics, f32.
        m_prev = m_ref[h]                                            # (Tq, 1)
        m_new = jnp.maximum(m_prev, jnp.max(s, axis=-1, keepdims=True))
        alpha = jnp.exp(m_prev - m_new)                              # (Tq, 1)
        e = jnp.exp(s - m_new)                                       # (Tq, Tk)
        l_ref[h] = alpha * l_ref[h] + jnp.sum(e, axis=-1, keepdims=True)
        m_ref[h] = m_new

        # PV matmul with un-normalized probs (normalization deferred), operands
        # in the activation dtype (bf16 MXU fast path), f32 accumulation.
        pv = jnp.dot(e.astype(v.dtype), v,
                     preferred_element_type=jnp.float32)             # (Tq, Dh)
        sl = slice(h * Dh, (h + 1) * Dh)
        acc_ref[:, sl] = alpha * acc_ref[:, sl] + pv

    @pl.when(ki == pl.num_programs(2) - 1)
    def _finalize():
        # Deferred softmax normalization: exact divide of the (Tq, Dh) context
        # slab (not an (S, S) probs multiply).  Dropout on probs is identity at
        # inference.  TODO(synk): pltpu.prng-based dropout for training mode.
        for h in range(num_heads):
            sl = slice(h * Dh, (h + 1) * Dh)
            acc_ref[:, sl] = acc_ref[:, sl] / l_ref[h]
        # Single lane-dense store of the head-packed (Tq, H) tile.
        o_ref[0] = acc_ref[...].astype(o_ref.dtype)


def self_attention(x, wq, wk, wv, bq, bk, bv, num_heads):
    """x: (B, S, H); wq/wk/wv: (H, H) in x @ W orientation; bq/bk/bv: (H,)."""
    B, S, H = x.shape
    if H % num_heads != 0:
        raise ValueError("hidden size must be a multiple of num_heads")
    Dh = H // num_heads
    scale = 1.0 / math.sqrt(Dh)

    # Fold the 1/sqrt(Dh) score scale into the query projection (one-time
    # (H, H) constant fold) and fuse the three projections so the kernel does a
    # single wide matmul with VMEM-resident weights.  Weights are fed to the
    # MXU in the activation dtype (bf16 fast path when x is bf16); bias stays
    # f32 for the f32 accumulate.
    wqkv = jnp.concatenate([wq * scale, wk, wv], axis=1).astype(x.dtype)
    bqkv = jnp.concatenate([bq * scale, bk, bv]).reshape(1, 3 * H).astype(jnp.float32)

    # Per-generation tile sizing knob (S multiples of 128 at realistic shapes).
    Tq = min(S, 128)
    Tk = min(S, 128)
    if S % Tq or S % Tk:
        raise ValueError("sequence length must be a multiple of the tile size")

    itemsize = jnp.dtype(x.dtype).itemsize
    # Explicit scoped-VMEM limit: 48 MiB fits every generation (v7x physical
    # VMEM is 64 MiB) and is well above the 16/32 MiB defaults.
    vmem_limit = 48 * 1024 * 1024

    # ---- Kernel 1: fused QKV projection -> (B, S, 3H), activation dtype ----
    qkv = pl.pallas_call(
        _qkv_proj_kernel,
        out_shape=jax.ShapeDtypeStruct((B, S, 3 * H), x.dtype),
        grid_spec=pltpu.PrefetchScalarGridSpec(
            num_scalar_prefetch=0,
            grid=(B, S // Tq),
            in_specs=[
                pl.BlockSpec((1, Tq, H), lambda b, i: (b, i, 0)),     # x tile
                # Constant block index -> weights/bias stay VMEM-resident.
                # TODO(synk): pipeline_mode=pl.Buffered(1) on these constant
                # tiles to drop the unused second buffer at large H.
                pl.BlockSpec((H, 3 * H), lambda b, i: (0, 0)),        # fused W
                pl.BlockSpec((1, 3 * H), lambda b, i: (0, 0)),        # fused b
            ],
            out_specs=pl.BlockSpec((1, Tq, 3 * H), lambda b, i: (b, i, 0)),
        ),
        compiler_params=pltpu.CompilerParams(
            dimension_semantics=("parallel", "parallel"),
            vmem_limit_bytes=vmem_limit),
        cost_estimate=pl.CostEstimate(
            flops=2 * B * S * H * 3 * H,
            transcendentals=0,
            bytes_accessed=(B * S * H + H * 3 * H + 3 * H
                            + B * S * 3 * H) * itemsize),
    )(x, wqkv, bqkv)

    # ---- Kernel 2: flash attention over (q-tile, kv-tile) -> (B, S, H) ------
    kernel = functools.partial(_flash_attn_kernel, num_heads=num_heads,
                               head_dim=Dh, hidden=H)
    out = pl.pallas_call(
        kernel,
        out_shape=jax.ShapeDtypeStruct((B, S, H), x.dtype),
        grid_spec=pltpu.PrefetchScalarGridSpec(
            num_scalar_prefetch=0,
            grid=(B, S // Tq, S // Tk),
            in_specs=[
                pl.BlockSpec((1, Tq, 3 * H), lambda b, qi, ki: (b, qi, 0)),
                pl.BlockSpec((1, Tk, 3 * H), lambda b, qi, ki: (b, ki, 0)),
            ],
            out_specs=pl.BlockSpec((1, Tq, H), lambda b, qi, ki: (b, qi, 0)),
            scratch_shapes=[
                pltpu.VMEM((num_heads, Tq, 1), jnp.float32),   # running max m
                pltpu.VMEM((num_heads, Tq, 1), jnp.float32),   # running sum l
                pltpu.VMEM((Tq, H), jnp.float32),              # context acc
            ],
        ),
        compiler_params=pltpu.CompilerParams(
            dimension_semantics=("parallel", "parallel", "arbitrary"),
            vmem_limit_bytes=vmem_limit),
        cost_estimate=pl.CostEstimate(
            flops=4 * B * num_heads * S * S * Dh,
            transcendentals=B * num_heads * S * S,
            bytes_accessed=(B * S * 3 * H * (1 + S // Tq)
                            + B * S * H) * itemsize),
    )(qkv, qkv)   # same array viewed through two BlockSpecs (q rows / kv rows)

    return out  # (B, S, H), head-packed — no wrapper transpose needed


def _reference(x, wq, wk, wv, bq, bk, bv, num_heads):
    B, S, H = x.shape
    Dh = H // num_heads

    def split(t):  # (B, S, H) -> (B, nh, S, Dh)
        return t.reshape(B, S, num_heads, Dh).transpose(0, 2, 1, 3)

    q = split(x @ wq + bq)
    k = split(x @ wk + bk)
    v = split(x @ wv + bv)
    scores = jnp.einsum("bhqd,bhkd->bhqk", q, k) / math.sqrt(Dh)
    probs = jax.nn.softmax(scores, axis=-1)
    ctx = jnp.einsum("bhqk,bhkd->bhqd", probs, v)
    return ctx.transpose(0, 2, 1, 3).reshape(B, S, H)


if __name__ == "__main__":
    B, S, H, num_heads = 2, 8, 32, 4
    dropout_prob = 0.1  # noted; attention-prob dropout is identity at inference

    key = jax.random.PRNGKey(0)
    kx, kq, kk, kv, kbq, kbk, kbv = jax.random.split(key, 7)
    x = jax.random.normal(kx, (B, S, H), dtype=jnp.float32)
    wscale = 1.0 / math.sqrt(H)
    wq = jax.random.normal(kq, (H, H), dtype=jnp.float32) * wscale
    wk = jax.random.normal(kk, (H, H), dtype=jnp.float32) * wscale
    wv = jax.random.normal(kv, (H, H), dtype=jnp.float32) * wscale
    bq = jax.random.normal(kbq, (H,), dtype=jnp.float32) * 0.02
    bk = jax.random.normal(kbk, (H,), dtype=jnp.float32) * 0.02
    bv = jax.random.normal(kbv, (H,), dtype=jnp.float32) * 0.02

    out = self_attention(x, wq, wk, wv, bq, bk, bv, num_heads)
    out = jax.block_until_ready(out)

    ref = _reference(x, wq, wk, wv, bq, bk, bv, num_heads)
    assert out.shape == (B, S, H)
    # Exact softmax normalization (no approx reciprocal) -> tight agreement;
    # tolerance leaves headroom for TPU matmul rounding at f32.
    assert jnp.max(jnp.abs(out - ref)) < 2e-3

    print("KERNEL_OK")
</pallas_src>

<mosaic_0001>
module attributes {stable_mosaic.version = 11 : i64} {
  func.func @_qkv_proj_kernel(%arg0: i32, %arg1: i32, %arg2: memref<1x8x32xf32, #tpu.memory_space<vmem>>, %arg3: memref<32x96xf32, #tpu.memory_space<vmem>>, %arg4: memref<1x96xf32, #tpu.memory_space<vmem>>, %arg5: memref<1x8x96xf32, #tpu.memory_space<vmem>>) attributes {dimension_semantics = [#tpu.dimension_semantics<parallel>, #tpu.dimension_semantics<parallel>], iteration_bounds = array<i64: 2, 1>, scalar_prefetch = 0 : i64, scratch_operands = 0 : i64, tpu.core_type = #tpu.core_type<tc>, window_params = [{transform_indices = @transform_0, window_bounds = array<i64: 1, 8, 32>}, {pipeline_mode = #tpu.pipeline_mode<synchronous>, transform_indices = @transform_1, window_bounds = array<i64: 32, 96>}, {pipeline_mode = #tpu.pipeline_mode<synchronous>, transform_indices = @transform_2, window_bounds = array<i64: 1, 96>}, {transform_indices = @transform_3, window_bounds = array<i64: 1, 8, 96>}]} {
    %c0 = arith.constant 0 : index
    %c0_0 = arith.constant 0 : index
    %c0_1 = arith.constant 0 : index
    %0 = vector.load %arg2[%c0, %c0_0, %c0_1] : memref<1x8x32xf32, #tpu.memory_space<vmem>>, vector<1x8x32xf32>
    %1 = vector.shape_cast %0 : vector<1x8x32xf32> to vector<8x32xf32>
    %c0_2 = arith.constant 0 : index
    %c0_3 = arith.constant 0 : index
    %2 = vector.load %arg3[%c0_2, %c0_3] : memref<32x96xf32, #tpu.memory_space<vmem>>, vector<32x96xf32>
    %c0_4 = arith.constant 0 : index
    %c0_5 = arith.constant 0 : index
    %3 = vector.load %arg4[%c0_4, %c0_5] : memref<1x96xf32, #tpu.memory_space<vmem>>, vector<1x96xf32>
    %cst = arith.constant dense<0.000000e+00> : vector<8x96xf32>
    %4 = tpu.matmul %1, %2, %cst {dimension_numbers = #tpu.dot_dimension_numbers<[1], [0], [0], [1], [0, 0, 1, 1], [], []>} : vector<8x32xf32>, vector<32x96xf32>, vector<8x96xf32> -> vector<8x96xf32>
    %5 = vector.broadcast %3 : vector<1x96xf32> to vector<8x96xf32>
    %6 = arith.addf %4, %5 : vector<8x96xf32>
    %c0_6 = arith.constant 0 : index
    %c0_7 = arith.constant 0 : index
    %c0_8 = arith.constant 0 : index
    %7 = vector.load %arg5[%c0_6, %c0_7, %c0_8] : memref<1x8x96xf32, #tpu.memory_space<vmem>>, vector<1x8x96xf32>
    %8 = vector.shape_cast %7 : vector<1x8x96xf32> to vector<8x96xf32>
    %9 = vector.shape_cast %6 : vector<8x96xf32> to vector<1x8x96xf32>
    tpu.vector_store %arg5[%c0_6, %c0_7, %c0_8], %9 {strides = array<i32>} : memref<1x8x96xf32, #tpu.memory_space<vmem>>, vector<1x8x96xf32>,
    return
  }
  func.func @transform_0(%arg0: i32, %arg1: i32) -> (i32, i32, i32) {
    %c0_i32 = arith.constant 0 : i32
    %c0_i32_0 = arith.constant 0 : i32
    return %arg0, %arg1, %c0_i32 : i32, i32, i32
  }
  func.func @transform_1(%arg0: i32, %arg1: i32) -> (i32, i32) {
    %c0_i32 = arith.constant 0 : i32
    %c0_i32_0 = arith.constant 0 : i32
    %c0_i32_1 = arith.constant 0 : i32
    return %c0_i32, %c0_i32_0 : i32, i32
  }
  func.func @transform_2(%arg0: i32, %arg1: i32) -> (i32, i32) {
    %c0_i32 = arith.constant 0 : i32
    %c0_i32_0 = arith.constant 0 : i32
    %c0_i32_1 = arith.constant 0 : i32
    return %c0_i32, %c0_i32_0 : i32, i32
  }
  func.func @transform_3(%arg0: i32, %arg1: i32) -> (i32, i32, i32) {
    %c0_i32 = arith.constant 0 : i32
    %c0_i32_0 = arith.constant 0 : i32
    return %arg0, %arg1, %c0_i32 : i32, i32, i32
  }
}

</mosaic_0001>

<bundles_post_ra>
// kernel: tpu_custom_call.1
= control target key start
LH: loop header
LB: loop body
LE: loop exit
PB: predicated region body
PF: predicated region fallthrough
CT: control target
= control target key end

     0   :  { %8 = vsyncpa [#allocation3], 0  ;;  %s864_s0 = inlined_call_operand.hbm [shape: f32[2,8,32], index: 0, kind: input, shape index: {}]   ;;  %s865_s1 = inlined_call_operand.hbm [shape: f32[32,96], index: 1, kind: input, shape index: {}]   ;;  %s866_s2 = inlined_call_operand.vmem [shape: f32[1,96], index: 2, kind: input, shape index: {}]   ;;  %s867_s3 = inlined_call_operand.hbm [shape: f32[2,8,96], index: 3, kind: output, shape index: {}]  }
   0x1   :  { %10 = vsyncpa [#allocation3 + $0x1], 0 }
   0x2   :  { %11 = vsyncpa [#allocation6], 0 }
   0x3   :  { %12 = vsyncpa [#allocation4], 0 }
   0x4   :  { %14 = vsyncpa [#allocation4 + $0x1], 0  ;;  %s688_s12 = smov 0   ;;  %s690_s13 = smov 0  }
   0x5   :  { %s692_s14 = smov 0   ;;  %s694_s15 = smov 0  }
   0x6   :  { %s696_s16 = smov 0   ;;  %s698_s17 = smov 0  }
   0x7 LB: > { %s411_s18 = sadd.s32 4294967295, %s659_s17   ;;  %s412_s19 = sadd.s32 4294967294, %s659_s17   ;;  %s659_s17 = sphi %s698_s17, %s20_s17   ;;  %s655_s16 = sphi %s696_s16, %s885_s16   ;;  %s651_s15 = sphi %s694_s15, %s884_s15   ;;  %s647_s14 = sphi %s692_s14, %s883_s14   ;;  %s643_s13 = sphi %s690_s13, %s882_s13   ;;  %s639_s12 = sphi %s688_s12, %s881_s12  }
   0x8   : > { %p54_p0 = scmp.ne.s32.totalorder %s643_s13, %s639_s12  ;;  %p722_p1 = scmp.eq.s32.totalorder %s411_s18, 0 }
   0x9   : > { %p726_p2 = scmp.eq.s32.totalorder %s411_s18, 1  ;;  %p128_p3 = scmp.eq.s32.totalorder %s412_s19, 1 }
   0xa   : > { %p732_p4 = por %p722_p1, %p54_p0  ;;  %p413_p5 = scmp.ge.s32.totalorder %s659_s17, 1 }
   0xb   : > { %p737_p6 = por %p128_p3, %p54_p0  ;;  %p135_p7 = scmp.lt.s32.totalorder %s659_s17, 3 }
   0xc   : > { %s871_s22 = scalar_select %p732_p4, 1, 0 }
   0xd   : > { %s872_s23 = scalar_select %p737_p6, 1, 0 }
   0xe   : > { %p742_p8 = pnand %p413_p5, %p135_p7  ;;  %s661_s25 = smov [#allocation5]  }
   0xf   : > { %s147_s26 = sshll.u32 %s661_s25, 4  ;;  %s32_s28 = sadd.s32 1, %s655_s16  ;;  %s148_s26 = int_to_ptr.vmem [resolvable:$true] %s147_s26 }
  0x10   : > { %p452_p9 = pneg %p742_p8  ;;  %s532_s29 = scalar_lea.vmem %s148_s26, 512 }
  0x11   : > { %p533_p13 = scmp.ne.s32.totalorder %s148_s26, %s532_s29  ;;  %p540_p5 = scmp.lt.s32.totalorder %s148_s26, %s148_s26 }
  0x12   : > { %p751_p11 = pnand %p452_p9, %p722_p1  ;;  %p541_p7 = scmp.lt.s32.totalorder %s532_s29, %s532_s29 }
  0x14   : > { %p523_p12 = pneg %p751_p11  ;;  %p542_p6 = por %p541_p7, %p540_p5 }
  0x16   : > { %p535_p0 = pnand %p533_p13, %p523_p12 }
  0x18   : > { %p536_p3 = pneg %p535_p0 }
  0x1a   : > { %p543_p4 = pnand %p542_p6, %p536_p3 }
  0x1c   : > { %546 = shalt.err (!%p543_p4)
}
  0x1d   : > { %s662_s30 = smov 128   ;;  %s663_s4 = smov 8  }
  0x1e   : > { %455 = dma.hbm_to_vmem [thread:$0]  (!%p751_p11), %s865_s1, 512, %s148_s26, [#allocation6], %s662_s30, %s662_s30, %s663_s4  }
  0x1f   : > { %p34_p6 = scmp.ge.s32.totalorder %s32_s28, 2  ;;  %s41_s7 = sadd.s32 1, %s647_s14 }
  0x20   : > { %p48_p4 = scmp.ne.s32.totalorder %s647_s14, %s643_s13  ;;  %p49_p9 = scmp.eq.s32.totalorder %s659_s17, 0 }
  0x21   : > { %s887_s28 = smov (%p34_p6, %s32_s28), 0  ;;  %p465_p0 = scmp.lt.s32.totalorder %s659_s17, 2 }
  0x22   : > { %p769_p12 = por %p49_p9, %p48_p4  ;;  %p775_p13 = por %p726_p2, %p48_p4 }
  0x23   : > { %s36_s10 = ssub.s32 %s655_s16, %s887_s28  ;;  %s164_s11 = sand.u32 1, %s647_s14  }
  0x24   : > { %p39_p11 = scmp.eq.s32.totalorder %s36_s10, 0  ;;  %s416_s18 = sshll.u32 %s164_s11, 3 }
  0x25   : > { %s417_s25 = sshll.u32 %s655_s16, 7  ;;  %s168_s30 = scalar_lea.vmem [#allocation2], %s416_s18 }
  0x26   : > { %s784_s19 = scalar_select %p39_p11, %s647_s14, %s41_s7  }
  0x27   : > { %s174_s29 = scalar_lea.hbm %s864_s0, %s417_s25  ;;  %s176_s4 = sshll.u32 %s168_s30, 4  ;;  %s177_s4 = int_to_ptr.vmem [resolvable:$true] %s176_s4 }
  0x28   : > { %p792_p2 = pnand %p465_p0, %p769_p12  ;;  %s165_s5 = scalar_lea.sflag [#allocation3], %s164_s11 }
  0x29   : > { %s560_s6 = scalar_lea.vmem %s177_s4, 128  ;;  %s664_s7 = smov [#allocation2]  }
  0x2a   : > { %p549_p3 = pneg %p792_p2  ;;  %p561_p5 = scmp.ne.s32.totalorder %s177_s4, %s560_s6 }
  0x2b   : > { %s565_s10 = sshll.u32 %s664_s7, 4  ;;  %s566_s10 = int_to_ptr.vmem [resolvable:$false] %s565_s10 }
  0x2c   : > { %p563_p7 = pnand %p561_p5, %p549_p3  ;;  %s567_s25 = scalar_lea.vmem %s566_s10, 256 }
  0x2d   : > { %p568_p4 = scmp.lt.s32.totalorder %s177_s4, %s566_s10  ;;  %p569_p9 = scmp.lt.s32.totalorder %s567_s25, %s560_s6 }
  0x2e   : > { %p564_p6 = pneg %p563_p7 }
  0x2f   : > { %p570_p11 = por %p569_p9, %p568_p4 }
  0x31   : > { %p571_p10 = pnand %p570_p11, %p564_p6 }
  0x33   : > { %574 = shalt.err (!%p571_p10)
}
  0x34   : > { %459 = dma.hbm_to_vmem [thread:$0]  (!%p792_p2), %s174_s29, 128, %s177_s4, %s165_s5  }
  0x35   : > { %185 = sbr.rel (%p742_p8) target bundleno = 278 (0x116), region = 32  ;;  %s803_s8 = sand.u32 (!%p742_p8), 1, %s643_s13  }
  0x36   : > { %s419_s11 = sshll.u32 (!%p742_p8), %s803_s8, 3  ;;  %s188_s18 = scalar_lea.sflag (!%p742_p8), [#allocation3], %s803_s8 }
  0x37   : > { %s191_s26 = scalar_lea.vmem (!%p742_p8), [#allocation2], %s419_s11  ;;  %p878_p12 = scmp.ne.s32.totalorder (!%p742_p8), %s871_s22, 0 }
  0x3a   : > { %626 = dma.done.wait (%p878_p12), %s188_s18, 128  }
  0x3b   : > { %628 = vsyncadd (%p878_p12), %s188_s18, 4294967168 }
  0x3c   : > { %630 = dma.done.wait (%p722_p1), [#allocation6], 512  }
  0x3d   : > { %632 = vsyncadd (%p722_p1), [#allocation6], 4294966784  ;;  %v665_v0 = vmov 0.0   ;;  %vm666_vm0 = vmmov 0   ;;  %v222_v1 = vld [vmem:[#allocation5 + $0x18] sm:$0xff]  ;;  %v221_v2 = vld [vmem:[#allocation5 + $0x10] sm:$0xff] }
  0x3e   : > { %433 = vmatprep.subr.mxu0 %v665_v0  ;;  %441 = vmatprep.mubr.msk.f32.mxu0 %vm666_vm0, %v665_v0  ;;  %v220_v3 = vld [vmem:[#allocation5 + $0x8] sm:$0xff]  ;;  %v219_v4 = vld [vmem:[#allocation5] sm:$0xff]  ;;  %v218_v5 = vld [vmem:[%s191_s26] sm:$0xff]  ;;  %vm230_vm1 = vcmask 261120   ;;  %s425_s24 = sshll.u32 %s651_s15, 7  ;;  %s217_s27 = scalar_lea.vmem [#allocation7], %s419_s11 }
  0x3f   : > { %434 = vmatpush3.msra.mxu0 %v222_v1  ;;  %v422_v6 = vld [vmem:[%s866_s2] ss:$0 sm:$0xff]  ;;  %s321_s29 = sshll.u32 %s217_s27, 4  ;;  %vm304_vm2 = vcmask 785408   ;;  %s822_s21 = scalar_lea.hbm %s867_s3, %s425_s24  ;;  %s322_s29 = int_to_ptr.vmem [resolvable:$true] %s321_s29 }
  0x40   : > { %435 = vmatprep.subr.mxu0 %v665_v0  ;;  %s307_s5 = scalar_lea.sflag [#allocation4], %s803_s8  ;;  %s575_s6 = scalar_lea.vmem %s322_s29, 128 }
  0x41   : > { %436 = vmatpush3.msra.mxu0 %v221_v2  ;;  %p576_p1 = scmp.ne.s32.totalorder %s322_s29, %s575_s6  ;;  %s667_s15 = smov [#allocation7]  }
  0x42   : > { %437 = vmatprep.subr.mxu0 %v665_v0  ;;  %s579_s7 = sshll.u32 %s667_s15, 4  ;;  %s580_s7 = int_to_ptr.vmem [resolvable:$false] %s579_s7 }
  0x43   : > { %438 = vmatpush3.msra.mxu0 %v220_v3  ;;  %p577_p8 = pnand %p576_p1, %p775_p13  ;;  %s581_s10 = scalar_lea.vmem %s580_s7, 256 }
  0x44   : > { %439 = vmatprep.subr.mxu0 %v665_v0  ;;  %p582_p0 = scmp.lt.s32.totalorder %s322_s29, %s580_s7  ;;  %p583_p2 = scmp.lt.s32.totalorder %s581_s10, %s575_s6 }
  0x45   : > { %440 = vmatpush3.msra.mxu0 %v219_v4  ;;  %p578_p10 = pneg %p577_p8 }
  0x46   : > { %442 = vmatmul.mubr.msk.f32.vlgmr.msra.gmra.mxu0 %vm230_vm1, %v218_v5  ;;  %p584_p3 = por %p583_p2, %p582_p0 }
  0x48   : > { %p585_p5 = pnand %p584_p3, %p578_p10 }
 0x106   : > { %v300_v7 = vpop.f32.mrf.mxu0 }
 0x107   : > { %v301_v8 = vadd.f32 %v422_v6, %v300_v7 }
 0x108   : > { %v443_v9 = vpop.f32.mrf.mxu0 }
 0x109   : > { %305 = vst.msk [vmem:[%s217_s27] sm:$0xff] %vm304_vm2, %v301_v8 }
 0x10a   : > { %588 = shalt.err (!%p585_p5)
}
 0x10b   : > { %s589_s25 = scalar_lea.hbm %s822_s21, 128  ;;  %s593_s18 = scalar_lea.hbm %s867_s3, 256 }
 0x10c   : > { %p590_p7 = scmp.ne.s32.totalorder %s822_s21, %s589_s25  ;;  %p594_p9 = scmp.lt.s32.totalorder %s822_s21, %s867_s3 }
 0x10d   : > { %p595_p11 = scmp.lt.s32.totalorder %s593_s18, %s589_s25 }
 0x10e   : > { %p591_p6 = pnand %p590_p7, %p775_p13 }
 0x10f   : > { %p596_p12 = por %p595_p11, %p594_p9 }
 0x110   : > { %p592_p4 = pneg %p591_p6 }
 0x112   : > { %p597_p1 = pnand %p596_p12, %p592_p4 }
 0x114   : > { %600 = shalt.err (!%p597_p1)
}
 0x115   : > { %450 = dma.vmem_to_hbm [thread:$0]  (%p775_p13), %s322_s29, 128, %s822_s21, %s307_s5  }
 0x116 PF: > { %s333_s22 = sand.u32 1, %s639_s12   ;;  %p879_p8 = scmp.ne.s32.totalorder %s872_s23, 0 }
 0x117   : > { %p880_p10 = scmp.ge.s32.totalorder %s659_s17, 2  ;;  %s334_s24 = scalar_lea.sflag [#allocation4], %s333_s22 }
 0x119   : > { %p461_p0 = pnand %p880_p10, %p879_p8 }
 0x11b   : > { %p462_p2 = pneg %p461_p0 }
 0x11d   : > { %634 = dma.done.wait (%p462_p2), %s334_s24, 128  }
 0x11e   : > { %636 = vsyncadd (%p462_p2), %s334_s24, 4294967168  ;;  %s20_s17 = sadd.s32 1, %s659_s17   ;;  %s881_s12 = smov %s643_s13 }
 0x11f   : > { %p17_p3 = scmp.ge.s32.totalorder %s20_s17, 4   ;;  %s882_s13 = smov %s647_s14 }
 0x120   : > { %s883_s14 = smov %s784_s19  ;;  %s884_s15 = smov %s655_s16 }
 0x121   : > { %s885_s16 = smov %s887_s28  ;;  %19 = sbr.rel (!%p17_p3) target bundleno = 7 (0x7), region = 81 }
 0x126   :  { %339 = vsyncpa [#allocation3], 1 }
 0x127   :  { %341 = vsyncpa [#allocation3 + $0x1], 1 }
 0x128   :  { %342 = vsyncpa [#allocation6], 1 }
 0x129   :  { %343 = vsyncpa [#allocation4], 1 }
 0x12a   :  { %345 = vsyncpa [#allocation4 + $0x1], 1 }

</bundles_post_ra>
